<compile_context>
chip_gen: v6e
topology: v6e:2x2x1
jax: 0.10.0
libtpu: 0.0.40
codegen_flags: <defaults>
</compile_context>

<pallas_src>
import functools

import jax
import jax.numpy as jnp
from jax.experimental import pallas as pl
from jax.experimental.pallas import tpu as pltpu

EPS = 1e-5


def _round_up(x, m):
    return (x + m - 1) // m * m


# ----------------------------- Pallas kernel ------------------------------ #

def _conv_bn_kernel(x_ref, w_ref, b_ref, o_ref, patch_ref, *,
                    k, s, Wp, R, Ltile, cinp, n_tiles):
    """One (batch, row-tile) step: fused-tap conv matmul + folded-BN bias.

    x_ref     : (1, Cinp, Lin)     bf16  zero-padded, flattened input (resident)
    w_ref     : (Coutp, k*k*Cinp)  bf16  fused tap weights, BN scale folded in
    b_ref     : (Coutp, 1)         f32   folded BN bias (+ conv bias)
    o_ref     : (1, Coutp, Ltile)  bf16  R output rows, Wp lanes per row (+ pad)
    patch_ref : (k*k*Cinp, Ltile)  bf16  scratch: stacked shifted windows
    """
    # first output row of this tile (Python 0 when there is a single row tile,
    # so all slices below are fully static in that case)
    row0 = 0 if n_tiles == 1 else pl.program_id(1) * R

    if s == 1:
        # Stride-1: the R per-row windows of one tap are contiguous in the
        # flat layout -> a single (Cinp, Ltile) copy per tap.
        for dy in range(k):
            for dx in range(k):
                t = dy * k + dx
                off = (row0 + dy) * Wp + dx
                patch_ref[t * cinp:(t + 1) * cinp, :] = x_ref[0, :, pl.ds(off, Ltile)]
    else:
        # Strided rows: one padded-width window per (tap, output row).
        if Ltile > R * Wp:   # keep the lane-pad tail deterministic
            patch_ref[:, R * Wp:] = jnp.zeros(
                (patch_ref.shape[0], Ltile - R * Wp), patch_ref.dtype)
        for rr in range(R):
            for dy in range(k):
                for dx in range(k):
                    t = dy * k + dx
                    off = ((row0 + rr) * s + dy) * Wp + dx
                    patch_ref[t * cinp:(t + 1) * cinp, rr * Wp:(rr + 1) * Wp] = \
                        x_ref[0, :, pl.ds(off, Wp)]

    # single fused matmul: (Coutp, k*k*Cinp) x (k*k*Cinp, Ltile), f32 accumulate
    acc = jnp.dot(w_ref[...], patch_ref[...], preferred_element_type=jnp.float32)
    o_ref[0] = (acc + b_ref[...]).astype(o_ref.dtype)


# ----------------------------- glue / wrapper ------------------------------ #

def conv2d_bn_pallas(x, params, *, k, s, p, tile_lanes=1024):
    """x: (N, Cin, H, W) f32 NCHW.  Returns BN(Conv2d(x)) as (N, Cout, Ho, Wo) f32."""
    N, Cin, H, W = x.shape
    w = params["weight"]                               # (Cout, Cin, k, k)
    Cout = w.shape[0]

    Hp, Wp = H + 2 * p, W + 2 * p
    assert Hp >= k and Wp >= k
    Ho = (Hp - k) // s + 1
    Wo = (Wp - k) // s + 1
    W1 = Wp - k + 1                                    # stride-1 valid output width

    Cinp = _round_up(Cin, 8)
    Coutp = _round_up(Cout, 8)

    # rows per output tile: target ~tile_lanes output lanes per grid step
    R = max(1, min(Ho, -(-tile_lanes // Wp)))
    n_tiles = -(-Ho // R)
    Ltile = _round_up(R * Wp, 128)                     # lane-dense, unmasked stores

    # flat input length must cover the furthest in-kernel window read
    if s == 1:
        need = ((n_tiles - 1) * R + (k - 1)) * Wp + (k - 1) + Ltile
    else:
        need = ((n_tiles * R - 1) * s + (k - 1)) * Wp + (k - 1) + Wp
    Lin = _round_up(max(need, Hp * Wp) + 1, 128)

    # zero-pad (spatial + channel), flatten per channel, bf16 matmul operand
    xpad = jnp.pad(x, ((0, 0), (0, Cinp - Cin), (p, p), (p, p)))
    xflat = xpad.reshape(N, Cinp, Hp * Wp)
    xflat = jnp.pad(xflat, ((0, 0), (0, 0), (0, Lin - Hp * Wp))).astype(jnp.bfloat16)

    # fold inference-mode BN (+ optional conv bias): scale into the weights,
    # only a per-channel bias add remains in the kernel epilogue.
    bn = params["bn"]
    scale = bn["gamma"] / jnp.sqrt(bn["var"] + EPS)
    bias = bn["beta"] - bn["mean"] * scale
    if params.get("bias") is not None:
        bias = bias + params["bias"] * scale

    w2 = jnp.transpose(w, (0, 2, 3, 1)) * scale[:, None, None, None]   # (Cout,k,k,Cin)
    w2 = jnp.pad(w2, ((0, Coutp - Cout), (0, 0), (0, 0), (0, Cinp - Cin)))
    Kc = k * k * Cinp
    w2 = w2.reshape(Coutp, Kc).astype(jnp.bfloat16)
    bias_p = jnp.pad(bias, (0, Coutp - Cout)).reshape(Coutp, 1).astype(jnp.float32)

    kernel = functools.partial(_conv_bn_kernel, k=k, s=s, Wp=Wp, R=R,
                               Ltile=Ltile, cinp=Cinp, n_tiles=n_tiles)

    # rough VMEM budget (double-buffered input/output + weights + patch scratch)
    est = (2 * Cinp * Lin * 2 + 2 * Coutp * Kc * 2 + 2 * Coutp * 4
           + 2 * Coutp * Ltile * 2 + Kc * Ltile * 2)
    vmem_limit = int(min(max(2 * est + (4 << 20), 32 << 20), 96 << 20))

    out_pad = pl.pallas_call(
        kernel,
        grid=(N, n_tiles),
        in_specs=[
            pl.BlockSpec((1, Cinp, Lin), lambda n, j: (n, 0, 0)),   # resident over j
            pl.BlockSpec((Coutp, Kc), lambda n, j: (0, 0)),         # shared weights
            pl.BlockSpec((Coutp, 1), lambda n, j: (0, 0)),          # shared bias
        ],
        out_specs=pl.BlockSpec((1, Coutp, Ltile), lambda n, j: (n, 0, j)),
        out_shape=jax.ShapeDtypeStruct((N, Coutp, n_tiles * Ltile), jnp.bfloat16),
        scratch_shapes=[pltpu.VMEM((Kc, Ltile), jnp.bfloat16)],
        compiler_params=pltpu.CompilerParams(
            dimension_semantics=("parallel", "parallel"),
            vmem_limit_bytes=vmem_limit),
    )(xflat, w2, bias_p)

    # unpack: drop lane padding + junk columns/rows, apply the column stride
    out = out_pad.reshape(N, Coutp, n_tiles, Ltile)[:, :, :, :R * Wp]
    out = out.reshape(N, Coutp, n_tiles * R, Wp)[:, :Cout, :Ho, 0:W1:s]
    return out.astype(jnp.float32)


# ------------------------- params / pure-JAX reference --------------------- #

def init_params(key, cin, cout, k, bias=False):
    ks = jax.random.split(key, 6)

    def nrm(kk, shape, sc=0.1):
        return sc * jax.random.normal(kk, shape, jnp.float32)

    return dict(
        weight=nrm(ks[0], (cout, cin, k, k), 0.2),
        bias=(nrm(ks[1], (cout,)) if bias else None),
        bn=dict(gamma=1.0 + nrm(ks[2], (cout,)),
                beta=nrm(ks[3], (cout,)),
                mean=nrm(ks[4], (cout,)),
                var=0.5 + jnp.abs(nrm(ks[5], (cout,)))),
    )


def _q16(t):  # bf16-quantize (round-trip), matching the kernel's operand dtype
    return t.astype(jnp.bfloat16).astype(jnp.float32)


def ref_forward_matched(x, params, *, k, s, p, eps=EPS):
    """Reference mirroring the kernel numerics: BN scale folded into bf16
    weights, bf16 input operand, f32 accumulation, bias added afterwards."""
    bn = params["bn"]
    scale = bn["gamma"] / jnp.sqrt(bn["var"] + eps)
    bias = bn["beta"] - bn["mean"] * scale
    if params.get("bias") is not None:
        bias = bias + params["bias"] * scale
    w_eff = _q16(params["weight"] * scale[:, None, None, None])
    y = jax.lax.conv_general_dilated(
        _q16(x), w_eff, (s, s), [(p, p), (p, p)],
        dimension_numbers=("NCHW", "OIHW", "NCHW"),
        precision=jax.lax.Precision.HIGHEST)
    return y + bias.reshape(1, -1, 1, 1)


# ---------------------------------- main ----------------------------------- #

if __name__ == "__main__":
    key = jax.random.PRNGKey(0)

    configs = [
        # (N, Cin, Cout, H,  W,  k, s, p)
        (2, 16, 32, 16, 16, 3, 1, 1),    # 3x3 "same" conv (typical Conv2dBn use)
        (2, 16, 32, 16, 16, 1, 1, 0),    # 1x1 conv
        (2, 16, 32, 16, 16, 3, 2, 1),    # strided 3x3 conv
    ]

    for ci, (N, Cin, Cout, H, W, k, s, p) in enumerate(configs):
        kxi, kpi = jax.random.split(jax.random.fold_in(key, ci), 2)
        x = jax.random.normal(kxi, (N, Cin, H, W), jnp.float32)
        params = init_params(kpi, Cin, Cout, k, bias=False)

        out = jax.block_until_ready(conv2d_bn_pallas(x, params, k=k, s=s, p=p))

        Ho = (H + 2 * p - k) // s + 1
        Wo = (W + 2 * p - k) // s + 1
        assert out.shape == (N, Cout, Ho, Wo), out.shape
        assert bool(jnp.all(jnp.isfinite(out)))

        ref = ref_forward_matched(x, params, k=k, s=s, p=p)
        # kernel output passed through a final bf16 round-trip -> mixed tolerance
        err = float(jnp.max(jnp.abs(out - ref) / (1e-2 + 1e-2 * jnp.abs(ref))))
        if err > 1.0:
            raise AssertionError(f"config {ci}: Pallas vs reference scaled err = {err}")

    print("KERNEL_OK")
</pallas_src>

<mosaic_0001>
module attributes {stable_mosaic.version = 11 : i64} {
  func.func @_conv_bn_kernel(%arg0: i32, %arg1: i32, %arg2: memref<1x16x512xbf16, #tpu.memory_space<vmem>>, %arg3: memref<32x144xbf16, #tpu.memory_space<vmem>>, %arg4: memref<32x1xf32, #tpu.memory_space<vmem>>, %arg5: memref<1x32x384xbf16, #tpu.memory_space<vmem>>, %arg6: memref<144x384xbf16, #tpu.memory_space<vmem>>) attributes {dimension_semantics = [#tpu.dimension_semantics<parallel>, #tpu.dimension_semantics<parallel>], iteration_bounds = array<i64: 2, 1>, scalar_prefetch = 0 : i64, scratch_operands = 1 : i64, tpu.core_type = #tpu.core_type<tc>, window_params = [{transform_indices = @transform_0, window_bounds = array<i64: 1, 16, 512>}, {pipeline_mode = #tpu.pipeline_mode<synchronous>, transform_indices = @transform_1, window_bounds = array<i64: 32, 144>}, {pipeline_mode = #tpu.pipeline_mode<synchronous>, transform_indices = @transform_2, window_bounds = array<i64: 32, 1>}, {transform_indices = @transform_3, window_bounds = array<i64: 1, 32, 384>}]} {
    %c0 = arith.constant 0 : index
    %c0_0 = arith.constant 0 : index
    %c0_1 = arith.constant 0 : index
    %0 = vector.load %arg2[%c0, %c0_0, %c0_1] : memref<1x16x512xbf16, #tpu.memory_space<vmem>>, vector<1x16x384xbf16>
    %1 = vector.shape_cast %0 : vector<1x16x384xbf16> to vector<16x384xbf16>
    %c0_2 = arith.constant 0 : index
    %c0_3 = arith.constant 0 : index
    %2 = vector.load %arg6[%c0_2, %c0_3] : memref<144x384xbf16, #tpu.memory_space<vmem>>, vector<16x384xbf16>
    tpu.vector_store %arg6[%c0_2, %c0_3], %1 {strides = array<i32>} : memref<144x384xbf16, #tpu.memory_space<vmem>>, vector<16x384xbf16>,
    %c0_4 = arith.constant 0 : index
    %c0_5 = arith.constant 0 : index
    %c1 = arith.constant 1 : index
    %3 = vector.load %arg2[%c0_4, %c0_5, %c1] : memref<1x16x512xbf16, #tpu.memory_space<vmem>>, vector<1x16x384xbf16>
    %4 = vector.shape_cast %3 : vector<1x16x384xbf16> to vector<16x384xbf16>
    %c16 = arith.constant 16 : index
    %c0_6 = arith.constant 0 : index
    %5 = vector.load %arg6[%c16, %c0_6] : memref<144x384xbf16, #tpu.memory_space<vmem>>, vector<16x384xbf16>
    tpu.vector_store %arg6[%c16, %c0_6], %4 {strides = array<i32>} : memref<144x384xbf16, #tpu.memory_space<vmem>>, vector<16x384xbf16>,
    %c0_7 = arith.constant 0 : index
    %c0_8 = arith.constant 0 : index
    %c2 = arith.constant 2 : index
    %6 = vector.load %arg2[%c0_7, %c0_8, %c2] : memref<1x16x512xbf16, #tpu.memory_space<vmem>>, vector<1x16x384xbf16>
    %7 = vector.shape_cast %6 : vector<1x16x384xbf16> to vector<16x384xbf16>
    %c32 = arith.constant 32 : index
    %c0_9 = arith.constant 0 : index
    %8 = vector.load %arg6[%c32, %c0_9] : memref<144x384xbf16, #tpu.memory_space<vmem>>, vector<16x384xbf16>
    tpu.vector_store %arg6[%c32, %c0_9], %7 {strides = array<i32>} : memref<144x384xbf16, #tpu.memory_space<vmem>>, vector<16x384xbf16>,
    %c0_10 = arith.constant 0 : index
    %c0_11 = arith.constant 0 : index
    %c18 = arith.constant 18 : index
    %9 = vector.load %arg2[%c0_10, %c0_11, %c18] : memref<1x16x512xbf16, #tpu.memory_space<vmem>>, vector<1x16x384xbf16>
    %10 = vector.shape_cast %9 : vector<1x16x384xbf16> to vector<16x384xbf16>
    %c48 = arith.constant 48 : index
    %c0_12 = arith.constant 0 : index
    %11 = vector.load %arg6[%c48, %c0_12] : memref<144x384xbf16, #tpu.memory_space<vmem>>, vector<16x384xbf16>
    tpu.vector_store %arg6[%c48, %c0_12], %10 {strides = array<i32>} : memref<144x384xbf16, #tpu.memory_space<vmem>>, vector<16x384xbf16>,
    %c0_13 = arith.constant 0 : index
    %c0_14 = arith.constant 0 : index
    %c19 = arith.constant 19 : index
    %12 = vector.load %arg2[%c0_13, %c0_14, %c19] : memref<1x16x512xbf16, #tpu.memory_space<vmem>>, vector<1x16x384xbf16>
    %13 = vector.shape_cast %12 : vector<1x16x384xbf16> to vector<16x384xbf16>
    %c64 = arith.constant 64 : index
    %c0_15 = arith.constant 0 : index
    %14 = vector.load %arg6[%c64, %c0_15] : memref<144x384xbf16, #tpu.memory_space<vmem>>, vector<16x384xbf16>
    tpu.vector_store %arg6[%c64, %c0_15], %13 {strides = array<i32>} : memref<144x384xbf16, #tpu.memory_space<vmem>>, vector<16x384xbf16>,
    %c0_16 = arith.constant 0 : index
    %c0_17 = arith.constant 0 : index
    %c20 = arith.constant 20 : index
    %15 = vector.load %arg2[%c0_16, %c0_17, %c20] : memref<1x16x512xbf16, #tpu.memory_space<vmem>>, vector<1x16x384xbf16>
    %16 = vector.shape_cast %15 : vector<1x16x384xbf16> to vector<16x384xbf16>
    %c80 = arith.constant 80 : index
    %c0_18 = arith.constant 0 : index
    %17 = vector.load %arg6[%c80, %c0_18] : memref<144x384xbf16, #tpu.memory_space<vmem>>, vector<16x384xbf16>
    tpu.vector_store %arg6[%c80, %c0_18], %16 {strides = array<i32>} : memref<144x384xbf16, #tpu.memory_space<vmem>>, vector<16x384xbf16>,
    %c0_19 = arith.constant 0 : index
    %c0_20 = arith.constant 0 : index
    %c36 = arith.constant 36 : index
    %18 = vector.load %arg2[%c0_19, %c0_20, %c36] : memref<1x16x512xbf16, #tpu.memory_space<vmem>>, vector<1x16x384xbf16>
    %19 = vector.shape_cast %18 : vector<1x16x384xbf16> to vector<16x384xbf16>
    %c96 = arith.constant 96 : index
    %c0_21 = arith.constant 0 : index
    %20 = vector.load %arg6[%c96, %c0_21] : memref<144x384xbf16, #tpu.memory_space<vmem>>, vector<16x384xbf16>
    tpu.vector_store %arg6[%c96, %c0_21], %19 {strides = array<i32>} : memref<144x384xbf16, #tpu.memory_space<vmem>>, vector<16x384xbf16>,
    %c0_22 = arith.constant 0 : index
    %c0_23 = arith.constant 0 : index
    %c37 = arith.constant 37 : index
    %21 = vector.load %arg2[%c0_22, %c0_23, %c37] : memref<1x16x512xbf16, #tpu.memory_space<vmem>>, vector<1x16x384xbf16>
    %22 = vector.shape_cast %21 : vector<1x16x384xbf16> to vector<16x384xbf16>
    %c112 = arith.constant 112 : index
    %c0_24 = arith.constant 0 : index
    %23 = vector.load %arg6[%c112, %c0_24] : memref<144x384xbf16, #tpu.memory_space<vmem>>, vector<16x384xbf16>
    tpu.vector_store %arg6[%c112, %c0_24], %22 {strides = array<i32>} : memref<144x384xbf16, #tpu.memory_space<vmem>>, vector<16x384xbf16>,
    %c0_25 = arith.constant 0 : index
    %c0_26 = arith.constant 0 : index
    %c38 = arith.constant 38 : index
    %24 = vector.load %arg2[%c0_25, %c0_26, %c38] : memref<1x16x512xbf16, #tpu.memory_space<vmem>>, vector<1x16x384xbf16>
    %25 = vector.shape_cast %24 : vector<1x16x384xbf16> to vector<16x384xbf16>
    %c128 = arith.constant 128 : index
    %c0_27 = arith.constant 0 : index
    %26 = vector.load %arg6[%c128, %c0_27] : memref<144x384xbf16, #tpu.memory_space<vmem>>, vector<16x384xbf16>
    tpu.vector_store %arg6[%c128, %c0_27], %25 {strides = array<i32>} : memref<144x384xbf16, #tpu.memory_space<vmem>>, vector<16x384xbf16>,
    %c0_28 = arith.constant 0 : index
    %c0_29 = arith.constant 0 : index
    %27 = vector.load %arg3[%c0_28, %c0_29] : memref<32x144xbf16, #tpu.memory_space<vmem>>, vector<32x144xbf16>
    %c0_30 = arith.constant 0 : index
    %c0_31 = arith.constant 0 : index
    %28 = vector.load %arg6[%c0_30, %c0_31] : memref<144x384xbf16, #tpu.memory_space<vmem>>, vector<144x384xbf16>
    %cst = arith.constant dense<0.000000e+00> : vector<32x384xf32>
    %29 = tpu.matmul %27, %28, %cst {dimension_numbers = #tpu.dot_dimension_numbers<[1], [0], [0], [1], [0, 0, 1, 1], [], []>} : vector<32x144xbf16>, vector<144x384xbf16>, vector<32x384xf32> -> vector<32x384xf32>
    %c0_32 = arith.constant 0 : index
    %c0_33 = arith.constant 0 : index
    %30 = vector.load %arg4[%c0_32, %c0_33] : memref<32x1xf32, #tpu.memory_space<vmem>>, vector<32x1xf32>
    %31 = vector.broadcast %30 : vector<32x1xf32> to vector<32x384xf32>
    %32 = arith.addf %29, %31 : vector<32x384xf32>
    %33 = arith.truncf %32 : vector<32x384xf32> to vector<32x384xbf16>
    %c0_34 = arith.constant 0 : index
    %c0_35 = arith.constant 0 : index
    %c0_36 = arith.constant 0 : index
    %34 = vector.load %arg5[%c0_34, %c0_35, %c0_36] : memref<1x32x384xbf16, #tpu.memory_space<vmem>>, vector<1x32x384xbf16>
    %35 = vector.shape_cast %34 : vector<1x32x384xbf16> to vector<32x384xbf16>
    %36 = vector.shape_cast %33 : vector<32x384xbf16> to vector<1x32x384xbf16>
    tpu.vector_store %arg5[%c0_34, %c0_35, %c0_36], %36 {strides = array<i32>} : memref<1x32x384xbf16, #tpu.memory_space<vmem>>, vector<1x32x384xbf16>,
    return
  }
  func.func @transform_0(%arg0: i32, %arg1: i32) -> (i32, i32, i32) {
    %c0_i32 = arith.constant 0 : i32
    %c0_i32_0 = arith.constant 0 : i32
    %c0_i32_1 = arith.constant 0 : i32
    return %arg0, %c0_i32, %c0_i32_0 : i32, i32, i32
  }
  func.func @transform_1(%arg0: i32, %arg1: i32) -> (i32, i32) {
    %c0_i32 = arith.constant 0 : i32
    %c0_i32_0 = arith.constant 0 : i32
    %c0_i32_1 = arith.constant 0 : i32
    return %c0_i32, %c0_i32_0 : i32, i32
  }
  func.func @transform_2(%arg0: i32, %arg1: i32) -> (i32, i32) {
    %c0_i32 = arith.constant 0 : i32
    %c0_i32_0 = arith.constant 0 : i32
    %c0_i32_1 = arith.constant 0 : i32
    return %c0_i32, %c0_i32_0 : i32, i32
  }
  func.func @transform_3(%arg0: i32, %arg1: i32) -> (i32, i32, i32) {
    %c0_i32 = arith.constant 0 : i32
    %c0_i32_0 = arith.constant 0 : i32
    return %arg0, %c0_i32, %arg1 : i32, i32, i32
  }
}

</mosaic_0001>

<bundles_post_ra>
// kernel: tpu_custom_call.1
= control target key start
LH: loop header
LB: loop body
LE: loop exit
PB: predicated region body
PF: predicated region fallthrough
CT: control target
= control target key end

     0   :  { %8 = vsyncpa [#allocation4], 0  ;;  %s1561_s0 = inlined_call_operand.hbm [shape: bf16[2,16,512], index: 0, kind: input, shape index: {}]   ;;  %s1562_s1 = inlined_call_operand.vmem [shape: bf16[32,144], index: 1, kind: input, shape index: {}]   ;;  %s1563_s2 = inlined_call_operand.vmem [shape: f32[32,1], index: 2, kind: input, shape index: {}]   ;;  %s1564_s3 = inlined_call_operand.hbm [shape: bf16[2,32,384], index: 3, kind: output, shape index: {}]  }
   0x1   :  { %10 = vsyncpa [#allocation4 + $0x1], 0 }
   0x2   :  { %11 = vsyncpa [#allocation5], 0 }
   0x3   :  { %13 = vsyncpa [#allocation5 + $0x1], 0  ;;  %s1282_s12 = smov 0   ;;  %s1284_s13 = smov 0  }
   0x4   :  { %s1286_s14 = smov 0   ;;  %s1288_s15 = smov 0  }
   0x5   :  { %s1290_s16 = smov 0   ;;  %s1292_s17 = smov 0  }
   0x6 LB: > { %s977_s18 = sadd.s32 4294967295, %s1245_s17   ;;  %s978_s19 = sadd.s32 4294967294, %s1245_s17   ;;  %s1245_s17 = sphi %s1292_s17, %s19_s17   ;;  %s1241_s16 = sphi %s1290_s16, %s1575_s16   ;;  %s1237_s15 = sphi %s1288_s15, %s1574_s15   ;;  %s1233_s14 = sphi %s1286_s14, %s1573_s14   ;;  %s1229_s13 = sphi %s1284_s13, %s1572_s13   ;;  %s1225_s12 = sphi %s1282_s12, %s1571_s12  }
   0x7   : > { %s31_s20 = sadd.s32 1, %s1241_s16  ;;  %s38_s21 = sadd.s32 1, %s1233_s14 }
   0x8   : > { %p33_p0 = scmp.ge.s32.totalorder %s31_s20, 2  ;;  %p45_p1 = scmp.ne.s32.totalorder %s1233_s14, %s1229_s13 }
   0x9   : > { %p46_p2 = scmp.eq.s32.totalorder %s1245_s17, 0  ;;  %p51_p3 = scmp.ne.s32.totalorder %s1229_s13, %s1225_s12 }
   0xa   : > { %s1577_s20 = smov (%p33_p0, %s31_s20), 0  ;;  %p52_p5 = scmp.eq.s32.totalorder %s977_s18, 0 }
   0xb   : > { %p1323_p4 = por %p46_p2, %p45_p1  ;;  %s35_s23 = ssub.s32 %s1241_s16, %s1577_s20 }
   0xc   : > { %p119_p6 = scmp.eq.s32.totalorder %s977_s18, 1  ;;  %p36_p7 = scmp.eq.s32.totalorder %s35_s23, 0 }
   0xd   : > { %p1329_p8 = por %p52_p5, %p51_p3  ;;  %p125_p10 = scmp.eq.s32.totalorder %s978_s19, 1 }
   0xe   : > { %p1333_p9 = por %p119_p6, %p45_p1  ;;  %p1055_p13 = scmp.lt.s32.totalorder %s1245_s17, 2 }
   0xf   : > { %s1338_s26 = scalar_select %p36_p7, %s1233_s14, %s38_s21  }
  0x10   : > { %p1340_p11 = por %p125_p10, %p51_p3  ;;  %s151_s28 = sand.u32 1, %s1233_s14  }
  0x11   : > { %s981_s29 = sshll.u32 %s151_s28, 5  ;;  %s1032_s30 = sshll.u32 %s1241_s16, 9 }
  0x12   : > { %s161_s6 = scalar_lea.hbm %s1561_s0, %s1032_s30  ;;  %s155_s7 = scalar_lea.vmem [#allocation3], %s981_s29 }
  0x13   : > { %s162_s8 = sshll.u32 %s155_s7, 4  ;;  %p1353_p0 = pnand %p1055_p13, %p1323_p4  ;;  %s163_s8 = int_to_ptr.vmem [resolvable:$true] %s162_s8 }
  0x14   : > { %p984_p1 = scmp.ge.s32.totalorder %s1245_s17, 1  ;;  %s152_s10 = scalar_lea.sflag [#allocation4], %s151_s28 }
  0x15   : > { %p1139_p2 = pneg %p1353_p0  ;;  %s1150_s11 = scalar_lea.vmem %s163_s8, 512 }
  0x16   : > { %p1151_p3 = scmp.ne.s32.totalorder %s163_s8, %s1150_s11  ;;  %s1247_s18 = smov [#allocation3]  }
  0x17   : > { %s1155_s19 = sshll.u32 %s1247_s18, 4  ;;  %s1156_s19 = int_to_ptr.vmem [resolvable:$false] %s1155_s19 }
  0x18   : > { %p1153_p5 = pnand %p1151_p3, %p1139_p2  ;;  %s1157_s21 = scalar_lea.vmem %s1156_s19, 1024 }
  0x19   : > { %p1158_p7 = scmp.lt.s32.totalorder %s163_s8, %s1156_s19  ;;  %p1159_p10 = scmp.lt.s32.totalorder %s1157_s21, %s1150_s11 }
  0x1a   : > { %p1154_p6 = pneg %p1153_p5 }
  0x1b   : > { %p1160_p12 = por %p1159_p10, %p1158_p7 }
  0x1d   : > { %p1161_p4 = pnand %p1160_p12, %p1154_p6 }
  0x1f   : > { %1164 = shalt.err (!%p1161_p4)
}
  0x20   : > { %s1248_s22 = smov 256   ;;  %s1249_s23 = smov 16  }
  0x21   : > { %1050 = dma.hbm_to_vmem [thread:$0]  (!%p1353_p0), %s161_s6, 512, %s163_s8, %s152_s10, %s1248_s22, %s1248_s22, %s1249_s23  }
  0x22   : > { %p170_p13 = scmp.lt.s32.totalorder %s1245_s17, 3 }
  0x24   : > { %p171_p2 = pnand %p984_p1, %p170_p13 }
  0x25   : > { %s1366_s28 = sand.u32 (!%p171_p2), 1, %s1229_s13  }
  0x26   : > { %174 = sbr.rel (%p171_p2) target bundleno = 457 (0x1c9), region = 32  ;;  %s985_s29 = sshll.u32 (!%p171_p2), %s1366_s28, 5 }
  0x27   : > { %s177_s30 = scalar_lea.sflag (!%p171_p2), [#allocation4], %s1366_s28  ;;  %s1370_s4 = scalar_lea.vmem (!%p171_p2), [#allocation3], %s985_s29 }
  0x2b   : > { %1216 = dma.done.wait (%p1329_p8), %s177_s30, 512  }
  0x2c   : > { %1218 = vsyncadd (%p1329_p8), %s177_s30, 4294966784  ;;  %v1377_v0 = vld [vmem:[%s1370_s4 + $0x10] sm:$0xff]  ;;  %v1380_v1 = vld [vmem:[%s1370_s4] sm:$0xff]  ;;  %s1250_s5 = smov 91   ;;  %v1251_v4 = vmov 0   ;;  %s1252_s24 = smov 92  }
  0x2d   : > { %v427_v2 = vld [vmem:[%s1370_s4 + $0x18] sm:$0xff]  ;;  %436 = vrot.lane.b32.xlu1 %v1377_v0, %s1250_s5  ;;  %432 = vrot.lane.b32.xlu0 %v1380_v1, %s1250_s5  ;;  %v425_v3 = vld [vmem:[%s1370_s4 + $0x8] sm:$0xff]  ;;  %s1253_s6 = smov 108   ;;  %s1254_s7 = smov 109   ;;  %v991_v7 = vcombine.high %v1380_v1, %v1377_v0  ;;  %v990_v8 = vcombine.low %v1380_v1, %v1377_v0  ;;  %vm720_vm0 = vcmask 130048   ;;  %vm233_vm1 = vcmask 1043456  }
  0x2e   : > { %780 = vmatprep.subr.bf16.mxu1 %v1251_v4  ;;  %1118 = vset.pattern.permute.xlu0 %v1251_v4  ;;  %s1255_s8 = smov 110   ;;  %s1256_s9 = smov 126   ;;  %v206_v5 = vld [vmem:[%s1370_s4 + $0x8] sm:$0xf]  ;;  %v208_v6 = vld [vmem:[%s1370_s4 + $0x18] sm:$0xf] }
  0x2f   : > { %1119 = vset.pattern.permute.xlu1 %v1251_v4  ;;  %210 = vst [vmem:[#allocation2 + $0x8] sm:$0xf] %v206_v5  ;;  %212 = vst [vmem:[#allocation2 + $0x14] sm:$0xf] %v208_v6  ;;  %s1257_s10 = smov 127   ;;  %s1258_s19 = smov 90  }
  0x30   : > { %v1133_v9 = vld [vmem:[%s1562_s1 + $0x4] ss:$8 sps:$4 sm:$0xff]   ;;  %v536_v12 = vld [vmem:[%s1563_s2 + $0x10] sm:$0xff]  ;;  %v537_v13 = vld [vmem:[%s1563_s2 + $0x18] sm:$0xff]  ;;  %vm445_vm2 = vcmask 744448   ;;  %vm410_vm3 = vcmask 752640  }
  0x31   : > { %438 = vrot.lane.b32.xlu1 %v427_v2, %s1250_s5  ;;  %434 = vrot.lane.b32.xlu0 %v425_v3, %s1250_s5  ;;  %v534_v10 = vld [vmem:[%s1563_s2] sm:$0xff]  ;;  %v535_v11 = vld [vmem:[%s1563_s2 + $0x8] sm:$0xff]  ;;  %vm375_vm4 = vcmask 883712   ;;  %vm340_vm5 = vcmask 891904   ;;  %vm305_vm6 = vcmask 900096   ;;  %vm270_vm7 = vcmask 1031168  }
  0x32   : > { %1019 = vmatprep.mubr.msk.bf16.mxu1 %vm720_vm0, %v1133_v9  ;;  %1017 = vmatprep.mubr.msk.bf16.mxu0 %vm720_vm0, %v1133_v9  ;;  %vm235_vm8 = vcmask 1039360   ;;  %vm480_vm9 = vcmask 736256   ;;  %s1041_s18 = smul.u32 48, %s1366_s28  ;;  %s1259_s5 = smov [#allocation6]  }
  0x33   : > { %s1042_s21 = smul.u32 768, %s1237_s15  ;;  %s878_s15 = scalar_lea.sflag [#allocation5], %s1366_s28 }
  0x35   : > { %399 = vrot.lane.b32.xlu1 %v425_v3, %s1252_s24  ;;  %397 = vrot.lane.b32.xlu0 %v1380_v1, %s1252_s24  ;;  %s1510_s30 = scalar_lea.hbm %s1564_s3, %s1042_s21 }
  0x39   : > { %403 = vrot.lane.b32.xlu1 %v427_v2, %s1252_s24  ;;  %401 = vrot.lane.b32.xlu0 %v1377_v0, %s1252_s24  ;;  %s1169_s24 = sshll.u32 %s1259_s5, 4  ;;  %s1170_s24 = int_to_ptr.vmem [resolvable:$false] %s1169_s24 }
  0x3d   : > { %364 = vrot.lane.b32.xlu1 %v425_v3, %s1253_s6  ;;  %362 = vrot.lane.b32.xlu0 %v1380_v1, %s1253_s6 }
  0x41   : > { %368 = vrot.lane.b32.xlu1 %v427_v2, %s1253_s6  ;;  %366 = vrot.lane.b32.xlu0 %v1377_v0, %s1253_s6  ;;  %s1171_s6 = scalar_lea.vmem %s1170_s24, 1536 }
  0x45   : > { %329 = vrot.lane.b32.xlu1 %v425_v3, %s1254_s7  ;;  %327 = vrot.lane.b32.xlu0 %v1380_v1, %s1254_s7 }
  0x49   : > { %333 = vrot.lane.b32.xlu1 %v427_v2, %s1254_s7  ;;  %331 = vrot.lane.b32.xlu0 %v1377_v0, %s1254_s7 }
  0x4d   : > { %294 = vrot.lane.b32.xlu1 %v425_v3, %s1255_s8  ;;  %292 = vrot.lane.b32.xlu0 %v1380_v1, %s1255_s8 }
  0x51   : > { %298 = vrot.lane.b32.xlu1 %v427_v2, %s1255_s8  ;;  %296 = vrot.lane.b32.xlu0 %v1377_v0, %s1255_s8 }
  0x55   : > { %259 = vrot.lane.b32.xlu1 %v425_v3, %s1256_s9  ;;  %257 = vrot.lane.b32.xlu0 %v1380_v1, %s1256_s9 }
  0x59   : > { %263 = vrot.lane.b32.xlu1 %v427_v2, %s1256_s9  ;;  %261 = vrot.lane.b32.xlu0 %v1377_v0, %s1256_s9 }
  0x5d   : > { %223 = vrot.lane.b32.xlu1 %v425_v3, %s1257_s10  ;;  %221 = vrot.lane.b32.xlu0 %v1380_v1, %s1257_s10 }
  0x61   : > { %227 = vrot.lane.b32.xlu1 %v427_v2, %s1257_s10  ;;  %225 = vrot.lane.b32.xlu0 %v1377_v0, %s1257_s10 }
  0x65   : > { %469 = vrot.lane.b32.xlu1 %v425_v3, %s1258_s19  ;;  %467 = vrot.lane.b32.xlu0 %v1380_v1, %s1258_s19  ;;  %v1136_v1 = vld [vmem:[%s1562_s1 + $0x10] ss:$8 sps:$4 sm:$0xff]  }
  0x69   : > { %473 = vrot.lane.b32.xlu1 %v427_v2, %s1258_s19  ;;  %471 = vrot.lane.b32.xlu0 %v1377_v0, %s1258_s19  ;;  %s1496_s19 = scalar_lea.vmem [#allocation6], %s1041_s18 }
  0x6a   : > { %s893_s22 = sshll.u32 %s1496_s19, 4  ;;  %s1512_s22 = int_to_ptr.vmem [resolvable:$true] %s893_s22 }
  0x6b   : > { %s1165_s4 = scalar_lea.vmem %s1512_s22, 768  ;;  %p1172_p1 = scmp.lt.s32.totalorder %s1512_s22, %s1170_s24 }
  0x6c   : > { %p1166_p8 = scmp.ne.s32.totalorder %s1512_s22, %s1165_s4  ;;  %p1173_p3 = scmp.lt.s32.totalorder %s1171_s6, %s1165_s4 }
  0x6d   : > { %540 = vperm.xlu0 %1118, %v534_v10   ;;  %545 = vperm.xlu1 %1119, %v535_v11  }
  0x6e   : > { %p1167_p12 = pnand %p1166_p8, %p1333_p9  ;;  %p1174_p5 = por %p1173_p3, %p1172_p1 }
  0x70   : > { %p1168_p0 = pneg %p1167_p12 }
  0x71   : > { %550 = vperm.xlu1 %1119, %v536_v12   ;;  %555 = vperm.xlu0 %1118, %v537_v13  }
  0x72   : > { %p1175_p6 = pnand %p1174_p5, %p1168_p0 }
  0x9f   : > { %v437_v14 = vpop.permute.xlu1 %436  ;;  %v433_v15 = vpop.permute.xlu0 %432 }
  0xa0   : > { %v440_v16 = vrot.slane %v433_v15, 4  ;;  %v442_v19 = vrot.slane %v437_v14, 4 }
  0xa3   : > { %v439_v17 = vpop.permute.xlu1 %438  ;;  %v435_v18 = vpop.permute.xlu0 %434 }
  0xa4   : > { %v443_v20 = vrot.slane %v439_v17, 4  ;;  %v441_v21 = vrot.slane %v435_v18, 4 }
  0xa6   : > { %v448_v22 = vsel %vm233_vm1, %v442_v19, %v443_v20  ;;  %v450_v23 = vsel %vm445_vm2, %v439_v17, %v443_v20  ;;  %v444_v24 = vsel %vm233_vm1, %v440_v16, %v441_v21  ;;  %v447_v25 = vsel %vm445_vm2, %v435_v18, %v441_v21 }
  0xa7   : > { %v449_v26 = vsel %vm445_vm2, %v437_v14, %v448_v22  ;;  %458 = vst [vmem:[#allocation2 + $0xbc] sm:$0xf] %v450_v23  ;;  %v446_v27 = vsel %vm445_vm2, %v433_v15, %v444_v24  ;;  %456 = vst [vmem:[#allocation2 + $0xb0] sm:$0xf] %v447_v25  ;;  %v400_v28 = vpop.permute.xlu1 %399  ;;  %v398_v29 = vpop.permute.xlu0 %397 }
  0xa8   : > { %v406_v30 = vrot.slane %v400_v28, 4  ;;  %v405_v31 = vrot.slane %v398_v29, 4  ;;  %v1012_v32 = vcombine.high %v446_v27, %v449_v26  ;;  %v1011_v33 = vcombine.low %v446_v27, %v449_v26 }
  0xaa   : > { %v412_v34 = vsel %vm410_vm3, %v400_v28, %v406_v30  ;;  %v409_v35 = vsel %vm233_vm1, %v405_v31, %v406_v30  ;;  %727 = vmatprep.subr.bf16.mxu0 %v1012_v32 }
  0xab   : > { %421 = vst [vmem:[#allocation2 + $0x98] sm:$0xf] %v412_v34  ;;  %v411_v36 = vsel %vm410_vm3, %v398_v29, %v409_v35  ;;  %v404_v37 = vpop.permute.xlu1 %403  ;;  %v402_v38 = vpop.permute.xlu0 %401  ;;  %728 = vmatpush1.bf16.msra.mxu0 %v1011_v33 }
  0xac   : > { %v408_v39 = vrot.slane %v404_v37, 4  ;;  %v407_v40 = vrot.slane %v402_v38, 4 }
  0xae   : > { %v415_v41 = vsel %vm410_vm3, %v404_v37, %v408_v39  ;;  %v413_v42 = vsel %vm233_vm1, %v407_v40, %v408_v39  ;;  %v1120_v43 = vld [vmem:[#allocation2 + $0xb0] ss:$12 sps:$4 sm:$0xff]  }
  0xaf   : > { %423 = vst [vmem:[#allocation2 + $0xa4] sm:$0xf] %v415_v41  ;;  %v414_v44 = vsel %vm410_vm3, %v402_v38, %v413_v42  ;;  %v365_v45 = vpop.permute.xlu1 %364  ;;  %v363_v46 = vpop.permute.xlu0 %362  ;;  %781 = vmatpush1.bf16.msra.mxu1 %v1120_v43 }
  0xb0   : > { %v371_v47 = vrot.slane %v365_v45, 4  ;;  %v370_v48 = vrot.slane %v363_v46, 4  ;;  %v1009_v49 = vcombine.high %v411_v36, %v414_v44  ;;  %v1008_v50 = vcombine.low %v411_v36, %v414_v44  ;;  %782 = vmatprep.subr.bf16.mxu1 %v1251_v4 }
  0xb2   : > { %v377_v51 = vsel %vm375_vm4, %v365_v45, %v371_v47  ;;  %v374_v52 = vsel %vm233_vm1, %v370_v48, %v371_v47  ;;  %729 = vmatprep.subr.bf16.mxu0 %v1009_v49 }
  0xb3   : > { %386 = vst [vmem:[#allocation2 + $0x80] sm:$0xf] %v377_v51  ;;  %v376_v53 = vsel %vm375_vm4, %v363_v46, %v374_v52  ;;  %v369_v54 = vpop.permute.xlu1 %368  ;;  %v367_v55 = vpop.permute.xlu0 %366  ;;  %730 = vmatpush1.bf16.msra.mxu0 %v1008_v50 }
  0xb4   : > { %v373_v56 = vrot.slane %v369_v54, 4  ;;  %v372_v57 = vrot.slane %v367_v55, 4 }
  0xb6   : > { %v380_v58 = vsel %vm375_vm4, %v369_v54, %v373_v56  ;;  %v378_v59 = vsel %vm233_vm1, %v372_v57, %v373_v56  ;;  %v1121_v60 = vld [vmem:[#allocation2 + $0x98] ss:$12 sps:$4 sm:$0xff]  }
  0xb7   : > { %388 = vst [vmem:[#allocation2 + $0x8c] sm:$0xf] %v380_v58  ;;  %v379_v61 = vsel %vm375_vm4, %v367_v55, %v378_v59  ;;  %v330_v62 = vpop.permute.xlu1 %329  ;;  %v328_v63 = vpop.permute.xlu0 %327  ;;  %783 = vmatpush1.bf16.msra.mxu1 %v1121_v60 }
  0xb8   : > { %v336_v2 = vrot.slane %v330_v62, 4  ;;  %v335_v3 = vrot.slane %v328_v63, 4  ;;  %v1006_v5 = vcombine.high %v376_v53, %v379_v61  ;;  %v1005_v6 = vcombine.low %v376_v53, %v379_v61  ;;  %784 = vmatprep.subr.bf16.mxu1 %v1251_v4 }
  0xba   : > { %v342_v9 = vsel %vm340_vm5, %v330_v62, %v336_v2  ;;  %v339_v10 = vsel %vm233_vm1, %v335_v3, %v336_v2  ;;  %731 = vmatprep.subr.bf16.mxu0 %v1006_v5 }
  0xbb   : > { %351 = vst [vmem:[#allocation2 + $0x68] sm:$0xf] %v342_v9  ;;  %v341_v11 = vsel %vm340_vm5, %v328_v63, %v339_v10  ;;  %v334_v12 = vpop.permute.xlu1 %333  ;;  %v332_v13 = vpop.permute.xlu0 %331  ;;  %732 = vmatpush1.bf16.msra.mxu0 %v1005_v6 }
  0xbc   : > { %v338_v14 = vrot.slane %v334_v12, 4  ;;  %v337_v15 = vrot.slane %v332_v13, 4 }
  0xbe   : > { %v345_v16 = vsel %vm340_vm5, %v334_v12, %v338_v14  ;;  %v343_v17 = vsel %vm233_vm1, %v337_v15, %v338_v14  ;;  %v1122_v18 = vld [vmem:[#allocation2 + $0x80] ss:$12 sps:$4 sm:$0xff]  }
  0xbf   : > { %353 = vst [vmem:[#allocation2 + $0x74] sm:$0xf] %v345_v16  ;;  %v344_v19 = vsel %vm340_vm5, %v332_v13, %v343_v17  ;;  %v295_v20 = vpop.permute.xlu1 %294  ;;  %v293_v21 = vpop.permute.xlu0 %292  ;;  %785 = vmatpush1.bf16.msra.mxu1 %v1122_v18 }
  0xc0   : > { %v301_v22 = vrot.slane %v295_v20, 4  ;;  %v300_v23 = vrot.slane %v293_v21, 4  ;;  %v1003_v24 = vcombine.high %v341_v11, %v344_v19  ;;  %v1002_v25 = vcombine.low %v341_v11, %v344_v19  ;;  %786 = vmatprep.subr.bf16.mxu1 %v1251_v4 }
  0xc2   : > { %v307_v26 = vsel %vm305_vm6, %v295_v20, %v301_v22  ;;  %v304_v27 = vsel %vm233_vm1, %v300_v23, %v301_v22  ;;  %733 = vmatprep.subr.bf16.mxu0 %v1003_v24 }
  0xc3   : > { %316 = vst [vmem:[#allocation2 + $0x50] sm:$0xf] %v307_v26  ;;  %v306_v28 = vsel %vm305_vm6, %v293_v21, %v304_v27  ;;  %v299_v29 = vpop.permute.xlu1 %298  ;;  %v297_v30 = vpop.permute.xlu0 %296  ;;  %734 = vmatpush1.bf16.msra.mxu0 %v1002_v25 }
  0xc4   : > { %v303_v31 = vrot.slane %v299_v29, 4  ;;  %v302_v32 = vrot.slane %v297_v30, 4 }
  0xc6   : > { %v310_v33 = vsel %vm305_vm6, %v299_v29, %v303_v31  ;;  %v308_v34 = vsel %vm233_vm1, %v302_v32, %v303_v31  ;;  %v1123_v35 = vld [vmem:[#allocation2 + $0x68] ss:$12 sps:$4 sm:$0xff]  }
  0xc7   : > { %318 = vst [vmem:[#allocation2 + $0x5c] sm:$0xf] %v310_v33  ;;  %v309_v36 = vsel %vm305_vm6, %v297_v30, %v308_v34  ;;  %v260_v37 = vpop.permute.xlu1 %259  ;;  %v258_v38 = vpop.permute.xlu0 %257  ;;  %787 = vmatpush1.bf16.msra.mxu1 %v1123_v35  ;;  %v1127_v29 = vld [vmem:[#allocation2 + $0x8] ss:$12 sps:$4 sm:$0xff]  }
  0xc8   : > { %v266_v39 = vrot.slane %v260_v37, 4  ;;  %v265_v40 = vrot.slane %v258_v38, 4  ;;  %v1000_v41 = vcombine.high %v306_v28, %v309_v36  ;;  %v999_v42 = vcombine.low %v306_v28, %v309_v36  ;;  %788 = vmatprep.subr.bf16.mxu1 %v1251_v4  ;;  %v1134_v32 = vld [vmem:[%s1562_s1 + $0x14] ss:$8 sps:$4 sm:$0xff]  }
  0xca   : > { %v272_v43 = vsel %vm270_vm7, %v260_v37, %v266_v39  ;;  %v269_v44 = vsel %vm233_vm1, %v265_v40, %v266_v39  ;;  %735 = vmatprep.subr.bf16.mxu0 %v1000_v41 }
  0xcb   : > { %281 = vst [vmem:[#allocation2 + $0x38] sm:$0xf] %v272_v43  ;;  %v271_v45 = vsel %vm270_vm7, %v258_v38, %v269_v44  ;;  %v264_v46 = vpop.permute.xlu1 %263  ;;  %v262_v47 = vpop.permute.xlu0 %261  ;;  %736 = vmatpush1.bf16.msra.mxu0 %v999_v42 }
  0xcc   : > { %v268_v48 = vrot.slane %v264_v46, 4  ;;  %v267_v49 = vrot.slane %v262_v47, 4 }
  0xce   : > { %v275_v50 = vsel %vm270_vm7, %v264_v46, %v268_v48  ;;  %v273_v51 = vsel %vm233_vm1, %v267_v49, %v268_v48  ;;  %v1124_v52 = vld [vmem:[#allocation2 + $0x50] ss:$12 sps:$4 sm:$0xff]  }
  0xcf   : > { %283 = vst [vmem:[#allocation2 + $0x44] sm:$0xf] %v275_v50  ;;  %v274_v53 = vsel %vm270_vm7, %v262_v47, %v273_v51  ;;  %v224_v54 = vpop.permute.xlu1 %223  ;;  %v222_v55 = vpop.permute.xlu0 %221  ;;  %789 = vmatpush1.bf16.msra.mxu1 %v1124_v52 }
  0xd0   : > { %v230_v56 = vrot.slane %v224_v54, 4  ;;  %v229_v57 = vrot.slane %v222_v55, 4  ;;  %v997_v58 = vcombine.high %v271_v45, %v274_v53  ;;  %v996_v59 = vcombine.low %v271_v45, %v274_v53  ;;  %790 = vmatprep.subr.bf16.mxu1 %v1251_v4 }
  0xd2   : > { %v237_v60 = vsel %vm235_vm8, %v224_v54, %v230_v56  ;;  %v234_v61 = vsel %vm233_vm1, %v229_v57, %v230_v56  ;;  %737 = vmatprep.subr.bf16.mxu0 %v997_v58 }
  0xd3   : > { %246 = vst [vmem:[#allocation2 + $0x20] sm:$0xf] %v237_v60  ;;  %v236_v62 = vsel %vm235_vm8, %v222_v55, %v234_v61  ;;  %v228_v63 = vpop.permute.xlu1 %227  ;;  %v226_v2 = vpop.permute.xlu0 %225  ;;  %738 = vmatpush1.bf16.msra.mxu0 %v996_v59 }
  0xd4   : > { %v232_v3 = vrot.slane %v228_v63, 4  ;;  %v231_v5 = vrot.slane %v226_v2, 4 }
  0xd6   : > { %v240_v6 = vsel %vm235_vm8, %v228_v63, %v232_v3  ;;  %v238_v9 = vsel %vm233_vm1, %v231_v5, %v232_v3  ;;  %v1125_v10 = vld [vmem:[#allocation2 + $0x38] ss:$12 sps:$4 sm:$0xff]  }
  0xd7   : > { %248 = vst [vmem:[#allocation2 + $0x2c] sm:$0xf] %v240_v6  ;;  %v239_v11 = vsel %vm235_vm8, %v226_v2, %v238_v9  ;;  %v470_v12 = vpop.permute.xlu1 %469  ;;  %v468_v13 = vpop.permute.xlu0 %467  ;;  %791 = vmatpush1.bf16.msra.mxu1 %v1125_v10 }
  0xd8   : > { %v476_v14 = vrot.slane %v470_v12, 4  ;;  %v475_v15 = vrot.slane %v468_v13, 4  ;;  %v994_v16 = vcombine.high %v236_v62, %v239_v11  ;;  %v993_v17 = vcombine.low %v236_v62, %v239_v11  ;;  %792 = vmatprep.subr.bf16.mxu1 %v1251_v4 }
  0xda   : > { %v482_v18 = vsel %vm480_vm9, %v470_v12, %v476_v14  ;;  %v479_v19 = vsel %vm233_vm1, %v475_v15, %v476_v14  ;;  %739 = vmatprep.subr.bf16.mxu0 %v994_v16 }
  0xdb   : > { %491 = vst [vmem:[#allocation2 + $0xc8] sm:$0xf] %v482_v18  ;;  %v481_v20 = vsel %vm480_vm9, %v468_v13, %v479_v19  ;;  %v474_v21 = vpop.permute.xlu1 %473  ;;  %v472_v22 = vpop.permute.xlu0 %471  ;;  %740 = vmatpush1.bf16.msra.mxu0 %v993_v17 }
  0xdc   : > { %v478_v23 = vrot.slane %v474_v21, 4  ;;  %v477_v24 = vrot.slane %v472_v22, 4  ;;  %741 = vmatprep.subr.bf16.mxu0 %v991_v7  ;;  %v1131_v7 = vld [vmem:[%s1562_s1] ss:$8 sps:$4 sm:$0xff]  }
  0xde   : > { %v485_v25 = vsel %vm480_vm9, %v474_v21, %v478_v23  ;;  %v483_v26 = vsel %vm233_vm1, %v477_v24, %v478_v23  ;;  %v1126_v27 = vld [vmem:[#allocation2 + $0x20] ss:$12 sps:$4 sm:$0xff]  }
  0xdf   : > { %493 = vst [vmem:[#allocation2 + $0xd4] sm:$0xf] %v485_v25  ;;  %v484_v28 = vsel %vm480_vm9, %v472_v22, %v483_v26  ;;  %742 = vmatpush1.bf16.msra.mxu0 %v990_v8  ;;  %793 = vmatpush1.bf16.msra.mxu1 %v1126_v27 }
  0xe0   : > { %v1015_v30 = vcombine.high %v481_v20, %v484_v28  ;;  %v1014_v31 = vcombine.low %v481_v20, %v484_v28  ;;  %794 = vmatprep.subr.bf16.mxu1 %v1251_v4 }
  0xe2   : > { %757 = vmatprep.subr.bf16.mxu0 %v1015_v30 }
  0xe3   : > { %758 = vmatpush2.bf16.msra.mxu0 %v1014_v31  ;;  %795 = vmatpush1.bf16.msra.mxu1 %v1127_v29 }
  0xe4   : > { %810 = vmatprep.subr.bf16.mxu1 %v1251_v4 }
  0xe6   : > { %v1130_v0 = vld [vmem:[#allocation2 + $0xc8] ss:$12 sps:$4 sm:$0xff]   ;;  %760 = vmatmul.mubr.bf16.vlgmr.msra.gmra.mxu0 %v1131_v7 }
  0xe7   : > { %1018 = vmatprep.mubr.msk.bf16.mxu0 %vm720_vm0, %v1134_v32  ;;  %811 = vmatpush2.bf16.msra.mxu1 %v1130_v0 }
  0xe8   : > { %v541_v8 = vpop.permute.xlu0 %540  ;;  %v546_v35 = vpop.permute.xlu1 %545 }
  0xea   : > { %813 = vmatmul.mubr.bf16.vlgmr.msra.gmra.mxu1 %v1131_v7 }
  0xeb   : > { %1020 = vmatprep.mubr.msk.bf16.mxu1 %vm720_vm0, %v1134_v32 }
  0xec   : > { %v551_v42 = vpop.permute.xlu1 %550  ;;  %v556_v56 = vpop.permute.xlu0 %555 }
  0xee   : > { %770 = vmatmul.mubr.bf16.gmra.mxu0 %v1136_v1 }
  0xf2   : > { %821 = vmatmul.mubr.bf16.gmra.mxu1 %v1136_v1 }
 0x1a6   : > { %v761_v33 = vpop.f32.mrf.mxu0 }
 0x1a7   : > { %v762_v34 = vadd.f32 %v761_v33, %v541_v8 }
 0x1a8   : > { %v763_v4 = vpop.f32.mrf.mxu0 }
 0x1a9   : > { %v764_v36 = vadd.f32 %v763_v4, %v541_v8 }
 0x1aa   : > { %v765_v37 = vpop.f32.mrf.mxu0  ;;  %v814_v38 = vpop.f32.mrf.mxu1 }
 0x1ab   : > { %v1033_v39 = vpack.c.bf16 %v764_v36, %v762_v34  ;;  %v815_v40 = vadd.f32 %v814_v38, %v541_v8  ;;  %v766_v44 = vadd.f32 %v765_v37, %v546_v35 }
 0x1ac   : > { %v767_v41 = vpop.f32.mrf.mxu0  ;;  %v816_v43 = vpop.f32.mrf.mxu1 }
 0x1ad   : > { %869 = vst [vmem:[%s1496_s19] sm:$0xff] %v1033_v39  ;;  %v768_v45 = vadd.f32 %v767_v41, %v546_v35  ;;  %v1034_v46 = vpack.c.bf16 %v815_v40, %v815_v40 }
 0x1ae   : > { %v771_v47 = vpop.f32.mrf.mxu0  ;;  %v817_v48 = vpop.f32.mrf.mxu1 }
 0x1af   : > { %v1035_v49 = vpack.c.bf16 %v768_v45, %v766_v44  ;;  %v772_v50 = vadd.f32 %v771_v47, %v551_v42  ;;  %870 = vst [vmem:[%s1496_s19 + $0x8] sm:$0xf] %v1034_v46  ;;  %v818_v51 = vadd.f32 %v817_v48, %v546_v35 }
 0x1b0   : > { %v773_v52 = vpop.f32.mrf.mxu0  ;;  %v819_v53 = vpop.f32.mrf.mxu1 }
 0x1b1   : > { %871 = vst [vmem:[%s1496_s19 + $0xc] sm:$0xff] %v1035_v49  ;;  %v774_v54 = vadd.f32 %v773_v52, %v551_v42  ;;  %v1036_v55 = vpack.c.bf16 %v818_v51, %v818_v51 }
 0x1b2   : > { %v775_v57 = vpop.f32.mrf.mxu0  ;;  %v822_v58 = vpop.f32.mrf.mxu1 }
 0x1b3   : > { %v1037_v59 = vpack.c.bf16 %v774_v54, %v772_v50  ;;  %872 = vst [vmem:[%s1496_s19 + $0x14] sm:$0xf] %v1036_v55  ;;  %v823_v60 = vadd.f32 %v822_v58, %v551_v42  ;;  %v776_v63 = vadd.f32 %v775_v57, %v556_v56 }
 0x1b4   : > { %v777_v61 = vpop.f32.mrf.mxu0  ;;  %v824_v62 = vpop.f32.mrf.mxu1 }
 0x1b5   : > { %873 = vst [vmem:[%s1496_s19 + $0x18] sm:$0xff] %v1037_v59  ;;  %v778_v2 = vadd.f32 %v777_v61, %v556_v56  ;;  %v1038_v3 = vpack.c.bf16 %v823_v60, %v823_v60 }
 0x1b6   : > { %v825_v5 = vpop.f32.mrf.mxu1 }
 0x1b7   : > { %v1039_v6 = vpack.c.bf16 %v778_v2, %v776_v63  ;;  %874 = vst [vmem:[%s1496_s19 + $0x20] sm:$0xf] %v1038_v3  ;;  %v826_v9 = vadd.f32 %v825_v5, %v556_v56 }
 0x1b8   : > { %v827_v10 = vpop.f32.mrf.mxu1 }
 0x1b9   : > { %875 = vst [vmem:[%s1496_s19 + $0x24] sm:$0xff] %v1039_v6  ;;  %v1040_v11 = vpack.c.bf16 %v826_v9, %v826_v9 }
 0x1bb   : > { %876 = vst [vmem:[%s1496_s19 + $0x2c] sm:$0xf] %v1040_v11 }
 0x1bc   : > { %1178 = shalt.err (!%p1175_p6)
}
 0x1bd   : > { %s1179_s7 = scalar_lea.hbm %s1510_s30, 768  ;;  %s1183_s10 = scalar_lea.hbm %s1564_s3, 1536 }
 0x1be   : > { %p1180_p7 = scmp.ne.s32.totalorder %s1510_s30, %s1179_s7  ;;  %p1184_p13 = scmp.lt.s32.totalorder %s1510_s30, %s1564_s3 }
 0x1bf   : > { %p1185_p2 = scmp.lt.s32.totalorder %s1183_s10, %s1179_s7 }
 0x1c0   : > { %p1181_p10 = pnand %p1180_p7, %p1333_p9 }
 0x1c1   : > { %p1186_p8 = por %p1185_p2, %p1184_p13 }
 0x1c2   : > { %p1182_p4 = pneg %p1181_p10 }
 0x1c4   : > { %p1187_p12 = pnand %p1186_p8, %p1182_p4 }
 0x1c6   : > { %1190 = shalt.err (!%p1187_p12)
}
 0x1c7   : > { %s1260_s19 = smov 192   ;;  %s1261_s21 = smov 12  }
 0x1c8   : > { %1045 = dma.vmem_to_hbm [thread:$0]  (%p1333_p9), %s1512_s22, 768, %s1510_s30, %s878_s15, %s1260_s19, %s1260_s19, %s1261_s21  }
 0x1c9 PF: > { %s908_s23 = sand.u32 1, %s1225_s12   ;;  %p1570_p0 = scmp.ge.s32.totalorder %s1245_s17, 2 }
 0x1ca   : > { %s909_s29 = scalar_lea.sflag [#allocation5], %s908_s23 }
 0x1cb   : > { %p1052_p1 = pnand %p1570_p0, %p1340_p11 }
 0x1cd   : > { %p1053_p3 = pneg %p1052_p1 }
 0x1cf   : > { %1220 = dma.done.wait (%p1053_p3), %s909_s29, 768  }
 0x1d0   : > { %1222 = vsyncadd (%p1053_p3), %s909_s29, 4294966528  ;;  %s19_s17 = sadd.s32 1, %s1245_s17   ;;  %s1571_s12 = smov %s1229_s13 }
 0x1d1   : > { %p16_p5 = scmp.ge.s32.totalorder %s19_s17, 4   ;;  %s1572_s13 = smov %s1233_s14 }
 0x1d2   : > { %s1573_s14 = smov %s1338_s26  ;;  %s1574_s15 = smov %s1241_s16 }
 0x1d3   : > { %s1575_s16 = smov %s1577_s20  ;;  %18 = sbr.rel (!%p16_p5) target bundleno = 6 (0x6), region = 77 }
 0x1d8   :  { %914 = vsyncpa [#allocation4], 1 }
 0x1d9   :  { %916 = vsyncpa [#allocation4 + $0x1], 1 }
 0x1da   :  { %917 = vsyncpa [#allocation5], 1 }
 0x1db   :  { %919 = vsyncpa [#allocation5 + $0x1], 1 }

</bundles_post_ra>
